<compile_context>
chip_gen: v5e
topology: v5e:2x2
jax: 0.10.0
libtpu: 0.0.40
codegen_flags: <defaults>
</compile_context>

<pallas_src>
import jax
import jax.numpy as jnp
from jax.experimental import pallas as pl
from jax.experimental.pallas import tpu as pltpu


def transmit_kernel(w1_ref, seq_ref, seqc_ref, w3_ref, b_ref, tr_ref, out_ref):
    # w1_ref   : (C,)            SMEM — conv1 1x1 weights
    # seq_ref  : (BT, C, N, T)   native layout block of the large input
    # seqc_ref : (BT, M, C*T)    small input, re-laid out in the wrapper
    # w3_ref   : (T, C*T)        folded  w[t,c] * w2[t']
    # b_ref    : (N, M)          bias
    # tr_ref   : (N, M)          transmit mask
    # out_ref  : (BT, N, M)
    C = seq_ref.shape[1]

    # conv1: f1[b, n, t] = sum_c w1[c] * seq[b, c, n, t]
    # Scalar (SMEM) x vreg multiply-accumulate over the small, static channel
    # axis — pure VPU, no relayout of the big tensor.
    f1 = w1_ref[0] * seq_ref[:, 0]
    for c in range(1, C):
        f1 = f1 + w1_ref[c] * seq_ref[:, c]

    # conv2 + w folded: g[b, t, m] = sum_k W3[t, k] * seqc[b, m, k]
    #                              = (w @ f2[b])[t, m]
    g = jnp.einsum("tk,bmk->btm", w3_ref[...], seqc_ref[...],
                   preferred_element_type=jnp.float32)

    # Single MXU pass over the node dimension per batch sample:
    # logits[b] = f1[b] (N,T) @ g[b] (T,M)
    logits = jnp.einsum("bnt,btm->bnm", f1, g,
                        preferred_element_type=jnp.float32)
    logits = jax.nn.sigmoid(logits + b_ref[...][None])

    a = jnp.mean(logits, axis=1, keepdims=True)     # mean over nodes
    logits = jax.nn.sigmoid(logits - a)
    out_ref[...] = logits * tr_ref[...][None]


def _vmem_block_bytes(shape, dtype_bytes=4):
    """VMEM footprint of an f32 block (lane dim padded to 128, sublane to 8)."""
    s = list(shape)
    s[-1] = -(-s[-1] // 128) * 128
    if len(s) >= 2:
        s[-2] = -(-s[-2] // 8) * 8
    n = 1
    for d in s:
        n *= d
    return n * dtype_bytes


def _pick_batch_block(B, per_sample_vmem_bytes, *, target_steps=8,
                      budget_bytes=24 * 1024 * 1024):
    """Largest divisor of B keeping >= min(target_steps, B) grid steps and the
    double-buffered working set within a VMEM budget (safe on v7x's 64 MiB)."""
    min_steps = min(target_steps, B)
    best = 1
    for bt in range(1, B + 1):
        if B % bt != 0:
            continue
        if B // bt < min_steps:
            continue
        if 2 * bt * per_sample_vmem_bytes > budget_bytes:
            continue
        best = bt
    return best


def transmit_forward(seq, seq_cluster, w1, w2, w, b, transmit, *, batch_block=None):
    B, C, N, T = seq.shape
    M = seq_cluster.shape[2]
    CT = C * T

    # ---- one-time parameter folding / small-tensor re-layout (XLA side) ----
    # W3[t, c*T + t'] = w[t, c] * w2[t']   (shape (T, C*T))
    w3 = (w[:, :, None] * w2[None, None, :]).reshape(T, CT).astype(jnp.float32)
    # seq_cluster is the SMALL tensor: lay it out once as (B, M, C*T) so the
    # cluster side is one dense matmul and its DMA is contiguous.
    seqc_r = jnp.transpose(seq_cluster, (0, 2, 1, 3)).reshape(B, M, CT)
    seqc_r = seqc_r.astype(jnp.float32)
    # seq stays in native (B, C, N, T) layout — no extra HBM pass over the
    # dominant array.  conv1 happens in-kernel.
    seq = seq.astype(jnp.float32)
    w1 = w1.astype(jnp.float32)
    b = b.astype(jnp.float32)
    transmit = transmit.astype(jnp.float32)

    per_sample = (_vmem_block_bytes((C, N, T))
                  + _vmem_block_bytes((M, CT))
                  + _vmem_block_bytes((N, M)))
    if batch_block is None:
        batch_block = _pick_batch_block(B, per_sample)
    assert B % batch_block == 0, "batch_block must divide the batch"
    BT = batch_block

    out = pl.pallas_call(
        transmit_kernel,
        out_shape=jax.ShapeDtypeStruct((B, N, M), jnp.float32),
        grid=(B // BT,),
        in_specs=[
            pl.BlockSpec(memory_space=pltpu.MemorySpace.SMEM),    # w1 (C,)
            pl.BlockSpec((BT, C, N, T), lambda i: (i, 0, 0, 0)),  # seq (native)
            pl.BlockSpec((BT, M, CT), lambda i: (i, 0, 0)),       # seq_cluster
            pl.BlockSpec((T, CT), lambda i: (0, 0)),              # W3
            pl.BlockSpec((N, M), lambda i: (0, 0)),               # b
            pl.BlockSpec((N, M), lambda i: (0, 0)),               # transmit
        ],
        out_specs=pl.BlockSpec((BT, N, M), lambda i: (i, 0, 0)),
        compiler_params=pltpu.CompilerParams(
            dimension_semantics=("parallel",),      # batch blocks independent
            vmem_limit_bytes=48 * 1024 * 1024,      # safe on v5e/v6e/v7x
        ),
    )(w1, seq, seqc_r, w3, b, transmit)
    return out


def reference(seq, seq_cluster, w1, w2, w, b, transmit):
    f1 = jnp.einsum("c,bcnt->bnt", w1, seq)
    f2 = jnp.einsum("t,bcmt->bcm", w2, seq_cluster)
    logits = jax.nn.sigmoid(jnp.einsum("bnt,tc->bnc", f1, w) @ f2 + b)
    a = jnp.mean(logits, axis=1, keepdims=True)
    logits = jax.nn.sigmoid(logits - a)
    return logits * transmit


if __name__ == "__main__":
    B, c_in, num_nodes, cluster_nodes, tem_size = 2, 4, 16, 8, 8

    key = jax.random.PRNGKey(0)
    k_seq, k_seqc, k_w1, k_w2, k_w, k_tr = jax.random.split(key, 6)

    seq = jax.random.normal(k_seq, (B, c_in, num_nodes, tem_size), jnp.float32)
    seq_cluster = jax.random.normal(
        k_seqc, (B, c_in, cluster_nodes, tem_size), jnp.float32
    )

    # Deterministic parameter init (shapes from the module __init__; both convs
    # are bias=False in the PyTorch module, so w1/w2 capture them exactly).
    w1 = jax.random.uniform(k_w1, (c_in,), jnp.float32, -0.5, 0.5)       # conv1
    w2 = jax.random.uniform(k_w2, (tem_size,), jnp.float32, -0.5, 0.5)   # conv2
    bound = (6.0 / (tem_size + c_in)) ** 0.5                             # xavier_uniform
    w = jax.random.uniform(k_w, (tem_size, c_in), jnp.float32, -bound, bound)
    b = jnp.zeros((num_nodes, cluster_nodes), jnp.float32)
    transmit = (
        jax.random.uniform(k_tr, (num_nodes, cluster_nodes)) > 0.5
    ).astype(jnp.float32)

    out = transmit_forward(seq, seq_cluster, w1, w2, w, b, transmit)
    out = jax.block_until_ready(out)

    ref = reference(seq, seq_cluster, w1, w2, w, b, transmit)
    assert out.shape == (B, num_nodes, cluster_nodes)
    assert jnp.allclose(out, ref, atol=1e-4, rtol=1e-4), "mismatch vs reference"

    print("KERNEL_OK")
</pallas_src>

<mosaic_0001>
module attributes {stable_mosaic.version = 11 : i64} {
  func.func @transmit_kernel(%arg0: i32, %arg1: memref<4xf32, #tpu.memory_space<smem>>, %arg2: memref<1x4x16x8xf32, #tpu.memory_space<vmem>>, %arg3: memref<1x8x32xf32, #tpu.memory_space<vmem>>, %arg4: memref<8x32xf32, #tpu.memory_space<vmem>>, %arg5: memref<16x8xf32, #tpu.memory_space<vmem>>, %arg6: memref<16x8xf32, #tpu.memory_space<vmem>>, %arg7: memref<1x16x8xf32, #tpu.memory_space<vmem>>) attributes {dimension_semantics = [#tpu.dimension_semantics<parallel>], iteration_bounds = array<i64: 2>, scalar_prefetch = 0 : i64, scratch_operands = 0 : i64, tpu.core_type = #tpu.core_type<tc>, window_params = [{transform_indices = @transform_0, window_bounds = array<i64: 4>}, {transform_indices = @transform_1, window_bounds = array<i64: 1, 4, 16, 8>}, {transform_indices = @transform_2, window_bounds = array<i64: 1, 8, 32>}, {pipeline_mode = #tpu.pipeline_mode<synchronous>, transform_indices = @transform_3, window_bounds = array<i64: 8, 32>}, {pipeline_mode = #tpu.pipeline_mode<synchronous>, transform_indices = @transform_4, window_bounds = array<i64: 16, 8>}, {pipeline_mode = #tpu.pipeline_mode<synchronous>, transform_indices = @transform_5, window_bounds = array<i64: 16, 8>}, {transform_indices = @transform_6, window_bounds = array<i64: 1, 16, 8>}]} {
    %c0 = arith.constant 0 : index
    %0 = memref.load %arg1[%c0] : memref<4xf32, #tpu.memory_space<smem>>
    %c0_0 = arith.constant 0 : index
    %c0_1 = arith.constant 0 : index
    %c0_2 = arith.constant 0 : index
    %c0_3 = arith.constant 0 : index
    %1 = vector.load %arg2[%c0_0, %c0_1, %c0_2, %c0_3] : memref<1x4x16x8xf32, #tpu.memory_space<vmem>>, vector<1x1x16x8xf32>
    %2 = vector.shape_cast %1 : vector<1x1x16x8xf32> to vector<1x16x8xf32>
    %3 = vector.broadcast %0 : f32 to vector<1x16x8xf32>
    %4 = arith.mulf %3, %2 : vector<1x16x8xf32>
    %c1 = arith.constant 1 : index
    %5 = memref.load %arg1[%c1] : memref<4xf32, #tpu.memory_space<smem>>
    %c0_4 = arith.constant 0 : index
    %c1_5 = arith.constant 1 : index
    %c0_6 = arith.constant 0 : index
    %c0_7 = arith.constant 0 : index
    %6 = vector.load %arg2[%c0_4, %c1_5, %c0_6, %c0_7] : memref<1x4x16x8xf32, #tpu.memory_space<vmem>>, vector<1x1x16x8xf32>
    %7 = vector.shape_cast %6 : vector<1x1x16x8xf32> to vector<1x16x8xf32>
    %8 = vector.broadcast %5 : f32 to vector<1x16x8xf32>
    %9 = arith.mulf %8, %7 : vector<1x16x8xf32>
    %10 = arith.addf %4, %9 : vector<1x16x8xf32>
    %c2 = arith.constant 2 : index
    %11 = memref.load %arg1[%c2] : memref<4xf32, #tpu.memory_space<smem>>
    %c0_8 = arith.constant 0 : index
    %c2_9 = arith.constant 2 : index
    %c0_10 = arith.constant 0 : index
    %c0_11 = arith.constant 0 : index
    %12 = vector.load %arg2[%c0_8, %c2_9, %c0_10, %c0_11] : memref<1x4x16x8xf32, #tpu.memory_space<vmem>>, vector<1x1x16x8xf32>
    %13 = vector.shape_cast %12 : vector<1x1x16x8xf32> to vector<1x16x8xf32>
    %14 = vector.broadcast %11 : f32 to vector<1x16x8xf32>
    %15 = arith.mulf %14, %13 : vector<1x16x8xf32>
    %16 = arith.addf %10, %15 : vector<1x16x8xf32>
    %c3 = arith.constant 3 : index
    %17 = memref.load %arg1[%c3] : memref<4xf32, #tpu.memory_space<smem>>
    %c0_12 = arith.constant 0 : index
    %c3_13 = arith.constant 3 : index
    %c0_14 = arith.constant 0 : index
    %c0_15 = arith.constant 0 : index
    %18 = vector.load %arg2[%c0_12, %c3_13, %c0_14, %c0_15] : memref<1x4x16x8xf32, #tpu.memory_space<vmem>>, vector<1x1x16x8xf32>
    %19 = vector.shape_cast %18 : vector<1x1x16x8xf32> to vector<1x16x8xf32>
    %20 = vector.broadcast %17 : f32 to vector<1x16x8xf32>
    %21 = arith.mulf %20, %19 : vector<1x16x8xf32>
    %22 = arith.addf %16, %21 : vector<1x16x8xf32>
    %c0_16 = arith.constant 0 : index
    %c0_17 = arith.constant 0 : index
    %23 = vector.load %arg4[%c0_16, %c0_17] : memref<8x32xf32, #tpu.memory_space<vmem>>, vector<8x32xf32>
    %c0_18 = arith.constant 0 : index
    %c0_19 = arith.constant 0 : index
    %c0_20 = arith.constant 0 : index
    %24 = vector.load %arg3[%c0_18, %c0_19, %c0_20] : memref<1x8x32xf32, #tpu.memory_space<vmem>>, vector<1x8x32xf32>
    "tpu.trace_start"() <{level = 10 : i32, message = "tk,bmk->btm"}> : () -> ()
    %cst = arith.constant dense<0.000000e+00> : vector<1x8x8xf32>
    %25 = tpu.matmul %24, %23, %cst {dimension_numbers = #tpu.dot_dimension_numbers<[2], [1], [0, 1], [0], [0, 0, 0, 1, 1, 0], [], []>} : vector<1x8x32xf32>, vector<8x32xf32>, vector<1x8x8xf32> -> vector<1x8x8xf32>
    %26 = tpu.transpose %25, [0, 2, 1] : vector<1x8x8xf32> -> vector<1x8x8xf32>
    "tpu.trace_stop"() : () -> ()
    "tpu.trace_start"() <{level = 10 : i32, message = "bnt,btm->bnm"}> : () -> ()
    %cst_21 = arith.constant dense<0.000000e+00> : vector<1x16x8xf32>
    %27 = tpu.matmul %22, %26, %cst_21 {dimension_numbers = #tpu.dot_dimension_numbers<[2], [1], [1], [2], [0, 0, 0, 1, 1, 2], [0], [0]>} : vector<1x16x8xf32>, vector<1x8x8xf32>, vector<1x16x8xf32> -> vector<1x16x8xf32>
    "tpu.trace_stop"() : () -> ()
    %c0_22 = arith.constant 0 : index
    %c0_23 = arith.constant 0 : index
    %28 = vector.load %arg5[%c0_22, %c0_23] : memref<16x8xf32, #tpu.memory_space<vmem>>, vector<16x8xf32>
    %29 = vector.shape_cast %28 : vector<16x8xf32> to vector<1x16x8xf32>
    %30 = arith.addf %27, %29 : vector<1x16x8xf32>
    %31 = arith.negf %30 : vector<1x16x8xf32>
    %32 = math.exp %31 : vector<1x16x8xf32>
    %cst_24 = arith.constant 1.000000e+00 : f32
    %33 = vector.broadcast %cst_24 : f32 to vector<1x16x8xf32>
    %34 = arith.addf %33, %32 : vector<1x16x8xf32>
    %35 = arith.divf %33, %34 : vector<1x16x8xf32>
    %cst_25 = arith.constant dense<0.000000e+00> : vector<1x8xf32>
    %36 = vector.multi_reduction <add>, %35, %cst_25 [1] : vector<1x16x8xf32> to vector<1x8xf32>
    %37 = vector.shape_cast %36 : vector<1x8xf32> to vector<1x1x8xf32>
    %cst_26 = arith.constant 1.600000e+01 : f32
    %38 = vector.broadcast %cst_26 : f32 to vector<1x1x8xf32>
    %39 = arith.divf %37, %38 : vector<1x1x8xf32>
    %40 = vector.broadcast %39 : vector<1x1x8xf32> to vector<1x16x8xf32>
    %41 = arith.subf %35, %40 : vector<1x16x8xf32>
    %42 = arith.negf %41 : vector<1x16x8xf32>
    %43 = math.exp %42 : vector<1x16x8xf32>
    %cst_27 = arith.constant 1.000000e+00 : f32
    %44 = vector.broadcast %cst_27 : f32 to vector<1x16x8xf32>
    %45 = arith.addf %44, %43 : vector<1x16x8xf32>
    %46 = arith.divf %44, %45 : vector<1x16x8xf32>
    %c0_28 = arith.constant 0 : index
    %c0_29 = arith.constant 0 : index
    %47 = vector.load %arg6[%c0_28, %c0_29] : memref<16x8xf32, #tpu.memory_space<vmem>>, vector<16x8xf32>
    %48 = vector.shape_cast %47 : vector<16x8xf32> to vector<1x16x8xf32>
    %49 = arith.mulf %46, %48 : vector<1x16x8xf32>
    %c0_30 = arith.constant 0 : index
    %c0_31 = arith.constant 0 : index
    %c0_32 = arith.constant 0 : index
    %50 = vector.load %arg7[%c0_30, %c0_31, %c0_32] : memref<1x16x8xf32, #tpu.memory_space<vmem>>, vector<1x16x8xf32>
    tpu.vector_store %arg7[%c0_30, %c0_31, %c0_32], %49 {strides = array<i32>} : memref<1x16x8xf32, #tpu.memory_space<vmem>>, vector<1x16x8xf32>,
    return
  }
  func.func @transform_0(%arg0: i32) -> i32 {
    %c0_i32 = arith.constant 0 : i32
    %c0_i32_0 = arith.constant 0 : i32
    return %c0_i32 : i32
  }
  func.func @transform_1(%arg0: i32) -> (i32, i32, i32, i32) {
    %c0_i32 = arith.constant 0 : i32
    %c0_i32_0 = arith.constant 0 : i32
    %c0_i32_1 = arith.constant 0 : i32
    %c0_i32_2 = arith.constant 0 : i32
    return %arg0, %c0_i32, %c0_i32_0, %c0_i32_1 : i32, i32, i32, i32
  }
  func.func @transform_2(%arg0: i32) -> (i32, i32, i32) {
    %c0_i32 = arith.constant 0 : i32
    %c0_i32_0 = arith.constant 0 : i32
    %c0_i32_1 = arith.constant 0 : i32
    return %arg0, %c0_i32, %c0_i32_0 : i32, i32, i32
  }
  func.func @transform_3(%arg0: i32) -> (i32, i32) {
    %c0_i32 = arith.constant 0 : i32
    %c0_i32_0 = arith.constant 0 : i32
    %c0_i32_1 = arith.constant 0 : i32
    return %c0_i32, %c0_i32_0 : i32, i32
  }
  func.func @transform_4(%arg0: i32) -> (i32, i32) {
    %c0_i32 = arith.constant 0 : i32
    %c0_i32_0 = arith.constant 0 : i32
    %c0_i32_1 = arith.constant 0 : i32
    return %c0_i32, %c0_i32_0 : i32, i32
  }
  func.func @transform_5(%arg0: i32) -> (i32, i32) {
    %c0_i32 = arith.constant 0 : i32
    %c0_i32_0 = arith.constant 0 : i32
    %c0_i32_1 = arith.constant 0 : i32
    return %c0_i32, %c0_i32_0 : i32, i32
  }
  func.func @transform_6(%arg0: i32) -> (i32, i32, i32) {
    %c0_i32 = arith.constant 0 : i32
    %c0_i32_0 = arith.constant 0 : i32
    %c0_i32_1 = arith.constant 0 : i32
    return %arg0, %c0_i32, %c0_i32_0 : i32, i32, i32
  }
}

</mosaic_0001>

<bundles_post_ra>
// kernel: tpu_custom_call.1
= control target key start
LH: loop header
LB: loop body
LE: loop exit
PB: predicated region body
PF: predicated region fallthrough
CT: control target
= control target key end

     0   :  { %11 = vsyncpa [#allocation3], 0  ;;  %s697_s21 = smov 0   ;;  %s748_s0 = inlined_call_operand.vmem [shape: f32[4], index: 0, kind: input, shape index: {}]   ;;  %s749_s1 = inlined_call_operand.vmem [shape: f32[2,4,16,8], index: 1, kind: input, shape index: {}]   ;;  %s750_s2 = inlined_call_operand.vmem [shape: f32[2,8,32], index: 2, kind: input, shape index: {}]   ;;  %s751_s3 = inlined_call_operand.vmem [shape: f32[8,32], index: 3, kind: input, shape index: {}]   ;;  %s752_s4 = inlined_call_operand.vmem [shape: f32[16,8], index: 4, kind: input, shape index: {}]   ;;  %s753_s5 = inlined_call_operand.vmem [shape: f32[16,8], index: 5, kind: input, shape index: {}]   ;;  %s754_s6 = inlined_call_operand.vmem [shape: f32[2,16,8], index: 6, kind: output, shape index: {}]  }
   0x1 LB: > { %s560_s22 = sadd.s32 4294967295, %s658_s21   ;;  %p562_p0 = scmp.ge.s32.totalorder %s658_s21, 1  ;;  %s658_s21 = sphi %s697_s21, %s17_s21  }
   0x2   : > { %p184_p1 = scmp.lt.s32.totalorder %s658_s21, 3  ;;  %s196_s25 = sshll.u32 %s748_s0, 4  ;;  %s197_s25 = int_to_ptr.vmem [resolvable:$true] %s196_s25 }
   0x3   : > { %p603_p3 = scmp.eq.s32.totalorder %s560_s22, 0  ;;  %s660_s26 = smov [#allocation2]  }
   0x4   : > { %p185_p2 = pnand %p562_p0, %p184_p1 }
   0x6   : > { %p599_p4 = pneg %p185_p2  ;;  %233 = sbr.rel (%p185_p2) target bundleno = 362 (0x16a), region = 44 }
   0x8   : > { %p600_p5 = pnand %p603_p3, %p599_p4 }
   0xa   : > { %602 = dma.vmem_to_smem (!%p600_p5), %s197_s25, 16, %s660_s26, [#allocation3]  }
   0xb   : > { %653 = dma.done.wait (%p603_p3), [#allocation3], 16  }
   0xc   : > { %655 = vsyncadd (%p603_p3), [#allocation3], 4294967280 }
   0xd   : > { %240 = sfence }
   0xe   : > { %v316_v0 = vld [vmem:[%s751_s3] sm:$0xff]  ;;  %vm318_vm0 = vcmask 261120   ;;  %p269_p6 = scmp.lt.s32.totalorder %s560_s22, 1  ;;  %s283_s9 = sld [smem:[#allocation2]]  ;;  %vm347_vm1 = vcmask 64512   ;;  %v346_v33 = vld [vmem:[%s752_s4 + $0x8] sm:$0xff] }
   0xf   : > { %581 = vmatpush.xpose.msk.msra.mxu0 %vm318_vm0, %v316_v0  ;;  %s572_s10 = sld [smem:[#allocation2 + $0x1]]  ;;  %v345_v29 = vld [vmem:[%s752_s4] sm:$0xff]  ;;  %v661_v44 = vmov 16.0  }
  0x10   : > { %s756_s22 = smov (!%p269_p6, %s560_s22), 1  ;;  %s575_s15 = sld [smem:[#allocation2 + $0x2]] }
  0x11   : > { %s569_s29 = sshll.u32 %s756_s22, 3  ;;  %s592_s11 = sshll.u32 %s756_s22, 6 }
  0x12   : > { %s277_s8 = scalar_lea.vmem %s750_s2, %s569_s29  ;;  %s273_s14 = scalar_lea.vmem %s749_s1, %s592_s11 }
  0x13   : > { %v317_v1 = vld [vmem:[%s277_s8] sm:$0xff]  ;;  %v573_v4 = vld [vmem:[%s273_s14 + $0x10] sm:$0xff]  ;;  %s578_s16 = sld [smem:[#allocation2 + $0x3]]  ;;  %v285_v6 = vld [vmem:[%s273_s14 + $0x8] sm:$0xff]  ;;  %s593_s23 = sshll.u32 %s756_s22, 4 }
  0x14   : > { %582 = vmatmul.msk.f32.vlgmr.msra.gmra.mxu0 %vm318_vm0, %v317_v1  ;;  %v284_v2 = vld [vmem:[%s273_s14] sm:$0xff]  ;;  %v286_v3 = vstv %s283_s9  ;;  %v574_v7 = vld [vmem:[%s273_s14 + $0x18] sm:$0xff]  ;;  %v577_v14 = vld [vmem:[%s273_s14 + $0x28] sm:$0xff]  ;;  %s282_s29 = scalar_lea.vmem %s754_s6, %s593_s23 }
  0x15   : > { %v293_v5 = vstv %s572_s10  ;;  %v287_v8 = vmul.f32 %v286_v3, %v284_v2  ;;  %v288_v10 = vmul.f32 %v286_v3, %v285_v6  ;;  %v576_v12 = vld [vmem:[%s273_s14 + $0x20] sm:$0xff]  ;;  %v579_v19 = vld [vmem:[%s273_s14 + $0x30] sm:$0xff]  ;;  %v580_v21 = vld [vmem:[%s273_s14 + $0x38] sm:$0xff] }
  0x16   : > { %v294_v9 = vmul.f32 %v573_v4, %v293_v5  ;;  %v295_v11 = vmul.f32 %v574_v7, %v293_v5  ;;  %v302_v13 = vstv %s575_s15 }
  0x17   : > { %v303_v16 = vmul.f32 %v576_v12, %v302_v13  ;;  %v304_v18 = vmul.f32 %v577_v14, %v302_v13 }
  0x18   : > { %v296_v15 = vadd.f32 %v294_v9, %v287_v8  ;;  %v297_v17 = vadd.f32 %v295_v11, %v288_v10 }
  0x19   : > { %v311_v20 = vstv %s578_s16 }
  0x1a   : > { %v305_v22 = vadd.f32 %v303_v16, %v296_v15  ;;  %v312_v23 = vmul.f32 %v579_v19, %v311_v20  ;;  %v306_v24 = vadd.f32 %v304_v18, %v297_v17  ;;  %v313_v25 = vmul.f32 %v580_v21, %v311_v20 }
  0x1c   : > { %v314_v27 = vadd.f32 %v312_v23, %v305_v22  ;;  %v315_v28 = vadd.f32 %v313_v25, %v306_v24 }
  0x91   : > { %v342_v26 = vpop.f32.mrf.mxu0 }
  0x92   : > { %583 = vmatpush.xpose.msk.msra.mxu1 %vm347_vm1, %v342_v26  ;;  %594 = vmatpush.xpose.msk.msra.mxu2 %vm347_vm1, %v342_v26 }
  0x95   : > { %584 = vmatmul.msk.f32.vlgmr.msra.gmra.mxu1 %vm347_vm1, %v314_v27  ;;  %585 = vmatmul.msk.f32.vlgmr.msra.gmra.mxu2 %vm347_vm1, %v315_v28 }
 0x112   : > { %v374_v30 = vpop.f32.mrf.mxu1 }
 0x113   : > { %v375_v31 = vadd.f32 %v374_v30, %v345_v29 }
 0x115   : > { %v586_v32 = vmul.f32 -1.442695, %v375_v31 }
 0x117   : > { %615 = vpow2.f32 %v586_v32 }
 0x118   : > { %v377_v34 = vpop.f32.mrf.mxu2 }
 0x119   : > { %v378_v35 = vadd.f32 %v377_v34, %v346_v33 }
 0x11b   : > { %v587_v36 = vmul.f32 -1.442695, %v378_v35 }
 0x11d   : > { %v616_v37 = vpop.eup %615  ;;  %617 = vpow2.f32 %v587_v36 }
 0x11e   : > { %v386_v38 = vadd.f32 1.0, %v616_v37  ;;  %v475_v37 = vld [vmem:[%s753_s5] sm:$0xff] }
 0x120   : > { %619 = vrcp.f32 %v386_v38  ;;  %vm393_vm2 = vweird.f32 %v386_v38  ;;  %v399_v49 = vand.u32 2147483648, %v386_v38  ;;  %v397_v50 = vand.u32 2147483647, %v386_v38 }
 0x122   : > { %v400_v57 = vor.u32 1.1754944e-38, %v399_v49  ;;  %vm398_vm6 = vcmp.eq.f32.partialorder %v397_v50, 8.507059e+37 }
 0x123   : > { %v618_v39 = vpop.eup %617 }
 0x124   : > { %v387_v40 = vadd.f32 1.0, %v618_v39 }
 0x126   : > { %v620_v41 = vpop.eup %619  ;;  %621 = vrcp.f32 %v387_v40  ;;  %v414_v53 = vand.u32 2147483648, %v387_v40  ;;  %v412_v56 = vand.u32 2147483647, %v387_v40  ;;  %vm408_vm7 = vweird.f32 %v387_v40 }
 0x127   : > { %v389_v42 = vmul.f32 %v620_v41, %v386_v38  ;;  %623 = vrcp.f32 %v661_v44  ;;  %vm394_vm3 = vweird.f32 %v620_v41 }
 0x128   : > { %vm395_vm4 = vmor %vm393_vm2, %vm394_vm3  ;;  %v415_v61 = vor.u32 1.1754944e-38, %v414_v53  ;;  %vm413_vm9 = vcmp.eq.f32.partialorder %v412_v56, 8.507059e+37 }
 0x129   : > { %v390_v43 = vsub.f32 1.0, %v389_v42 }
 0x12b   : > { %v391_v45 = vmul.f32 %v620_v41, %v390_v43 }
 0x12c   : > { %v622_v46 = vpop.eup %621 }
 0x12d   : > { %v392_v47 = vadd.f32 %v620_v41, %v391_v45  ;;  %v404_v48 = vmul.f32 %v622_v46, %v387_v40  ;;  %v624_v52 = vpop.eup %623  ;;  %vm409_vm5 = vweird.f32 %v622_v46  ;;  %v476_v40 = vld [vmem:[%s753_s5 + $0x8] sm:$0xff] }
 0x12e   : > { %v428_v59 = vmul.f32 16.0, %v624_v52  ;;  %vm410_vm8 = vmor %vm408_vm7, %vm409_vm5  ;;  %vm432_vm10 = vweird.f32 %v624_v52 }
 0x12f   : > { %v405_v51 = vsub.f32 1.0, %v404_v48  ;;  %v396_v54 = vsel %vm395_vm4, %v620_v41, %v392_v47 }
 0x130   : > { %v401_v60 = vsel %vm398_vm6, %v400_v57, %v396_v54  ;;  %v429_v2 = vsub.f32 1.0, %v428_v59 }
 0x131   : > { %v406_v55 = vmul.f32 %v622_v46, %v405_v51  ;;  %v418_v0 = vsel %vm347_vm1, %v401_v60, 0.0 }
 0x132   : > { %v430_v5 = vmul.f32 %v624_v52, %v429_v2 }
 0x133   : > { %v407_v58 = vadd.f32 %v622_v46, %v406_v55 }
 0x134   : > { %v431_v8 = vadd.f32 %v624_v52, %v430_v5 }
 0x135   : > { %v411_v62 = vsel %vm410_vm8, %v622_v46, %v407_v58 }
 0x136   : > { %v416_v63 = vsel %vm413_vm9, %v415_v61, %v411_v62  ;;  %v433_v11 = vsel %vm432_vm10, %v624_v52, %v431_v8 }
 0x137   : > { %v419_v1 = vsel %vm347_vm1, %v416_v63, 0.0 }
 0x138   : > { %v420_v3 = vadd.f32 %v419_v1, %v418_v0 }
 0x13a   : > { %v421_v4 = vrot.slane %v420_v3, 4 }
 0x13c   : > { %v422_v6 = vadd.f32 %v421_v4, %v420_v3 }
 0x13e   : > { %v423_v7 = vrot.slane %v422_v6, 2 }
 0x140   : > { %v424_v9 = vadd.f32 %v423_v7, %v422_v6 }
 0x142   : > { %v425_v10 = vrot.slane %v424_v9, 1 }
 0x144   : > { %v426_v12 = vadd.f32 %v425_v10, %v424_v9 }
 0x146   : > { %v434_v13 = vmul.f32 %v433_v11, %v426_v12 }
 0x148   : > { %v435_v14 = vsub.f32 %v401_v60, %v434_v13  ;;  %v436_v15 = vsub.f32 %v416_v63, %v434_v13 }
 0x14a   : > { %v588_v16 = vmul.f32 -1.442695, %v435_v14  ;;  %v589_v17 = vmul.f32 -1.442695, %v436_v15 }
 0x14c   : > { %625 = vpow2.f32 %v588_v16 }
 0x14d   : > { %627 = vpow2.f32 %v589_v17 }
 0x152   : > { %v626_v18 = vpop.eup %625 }
 0x153   : > { %v628_v19 = vpop.eup %627  ;;  %v443_v20 = vadd.f32 1.0, %v626_v18 }
 0x154   : > { %v444_v21 = vadd.f32 1.0, %v628_v19 }
 0x155   : > { %629 = vrcp.f32 %v443_v20  ;;  %v456_v27 = vand.u32 2147483648, %v443_v20  ;;  %v454_v30 = vand.u32 2147483647, %v443_v20  ;;  %vm450_vm13 = vweird.f32 %v443_v20 }
 0x156   : > { %631 = vrcp.f32 %v444_v21  ;;  %v471_v31 = vand.u32 2147483648, %v444_v21  ;;  %v469_v33 = vand.u32 2147483647, %v444_v21  ;;  %vm465_vm15 = vweird.f32 %v444_v21 }
 0x157   : > { %v457_v35 = vor.u32 1.1754944e-38, %v456_v27  ;;  %vm455_vm0 = vcmp.eq.f32.partialorder %v454_v30, 8.507059e+37 }
 0x158   : > { %v472_v39 = vor.u32 1.1754944e-38, %v471_v31  ;;  %vm470_vm3 = vcmp.eq.f32.partialorder %v469_v33, 8.507059e+37 }
 0x15b   : > { %v630_v22 = vpop.eup %629 }
 0x15c   : > { %v632_v23 = vpop.eup %631  ;;  %v446_v24 = vmul.f32 %v630_v22, %v443_v20  ;;  %vm451_vm11 = vweird.f32 %v630_v22 }
 0x15d   : > { %v461_v25 = vmul.f32 %v632_v23, %v444_v21  ;;  %vm466_vm12 = vweird.f32 %v632_v23  ;;  %vm452_vm14 = vmor %vm450_vm13, %vm451_vm11 }
 0x15e   : > { %v447_v26 = vsub.f32 1.0, %v446_v24  ;;  %vm467_vm2 = vmor %vm465_vm15, %vm466_vm12 }
 0x15f   : > { %v462_v28 = vsub.f32 1.0, %v461_v25 }
 0x160   : > { %v448_v29 = vmul.f32 %v630_v22, %v447_v26 }
 0x161   : > { %v463_v32 = vmul.f32 %v632_v23, %v462_v28 }
 0x162   : > { %v449_v34 = vadd.f32 %v630_v22, %v448_v29 }
 0x163   : > { %v464_v36 = vadd.f32 %v632_v23, %v463_v32 }
 0x164   : > { %v453_v38 = vsel %vm452_vm14, %v630_v22, %v449_v34 }
 0x165   : > { %v458_v41 = vsel %vm455_vm0, %v457_v35, %v453_v38  ;;  %v468_v42 = vsel %vm467_vm2, %v632_v23, %v464_v36 }
 0x166   : > { %v473_v43 = vsel %vm470_vm3, %v472_v39, %v468_v42  ;;  %v477_v44 = vmul.f32 %v475_v37, %v458_v41 }
 0x167   : > { %v478_v45 = vmul.f32 %v476_v40, %v473_v43 }
 0x168   : > { %479 = vst.msk [vmem:[%s282_s29] sm:$0xff] %vm347_vm1, %v477_v44 }
 0x169   : > { %480 = vst.msk [vmem:[%s282_s29 + $0x8] sm:$0xff] %vm347_vm1, %v478_v45 }
 0x16a PF: > { %s17_s21 = sadd.s32 1, %s658_s21  }
 0x16b   : > { %p14_p7 = scmp.ge.s32.totalorder %s17_s21, 4  }
 0x16d   :  { %16 = sbr.rel (!%p14_p7) target bundleno = 1 (0x1), region = 85 }
 0x172   :  { %502 = vsyncpa [#allocation3], 1 }
 0x173   :  { %504 = vsyncpa [#allocation3 + $0x1], 1 }

</bundles_post_ra>
